<compile_context>
chip_gen: v7x
topology: tpu7x:2x2x1
jax: 0.10.0
libtpu: 0.0.40
codegen_flags: <defaults>
</compile_context>

<pallas_src>
import functools

import jax
import jax.numpy as jnp
from jax.experimental import pallas as pl
from jax.experimental.pallas import tpu as pltpu


def _choose_tiling(hw, max_rows=2048):
    """Factor hw == rows * lanes (lanes multiple of 128 when possible) and pick
    a row-tile (multiple of 8, or the full row extent)."""
    if hw % 128 == 0:
        lanes = 128
        rows = hw // 128
    else:
        # Fallback: single full-extent row block (legal: equals full array dim).
        return 1, hw, 1
    if rows <= max_rows:
        return rows, lanes, rows
    t = max_rows - (max_rows % 8)
    while t >= 8:
        if rows % t == 0:
            return rows, lanes, t
        t -= 8
    return rows, lanes, rows  # no multiple-of-8 divisor; take the full slab


def _wbce_dice_kernel(n_elems, pred_ref, true_ref, out_ref, cls_acc, tot_acc):
    """Grid = (C, B, T). Streams (tile_rows, 128) tiles of one class, reduces
    per-class BCE/Dice partial sums in SMEM, accumulates totals across classes."""
    c = pl.program_id(0)
    b = pl.program_id(1)
    t = pl.program_id(2)
    nc = pl.num_programs(0)
    nb = pl.num_programs(1)
    nt = pl.num_programs(2)

    first_tile_of_class = (b == 0) & (t == 0)
    last_tile_of_class = (b == nb - 1) & (t == nt - 1)

    @pl.when((c == 0) & first_tile_of_class)
    def _init_totals():
        tot_acc[0] = 0.0  # running sum of per-class BCE means
        tot_acc[1] = 0.0  # running sum of per-class (1 - dsc)

    @pl.when(first_tile_of_class)
    def _init_class():
        cls_acc[0] = 0.0  # BCE sum
        cls_acc[1] = 0.0  # intersection
        cls_acc[2] = 0.0  # pred sum
        cls_acc[3] = 0.0  # true sum

    p = pred_ref[0, 0].astype(jnp.float32)   # (tile_rows, lanes)
    y = true_ref[0, 0].astype(jnp.float32)

    # F.binary_cross_entropy semantics: -(y*log(p) + (1-y)*log(1-p)),
    # each log term clamped at -100 (PyTorch), mean taken over B*H*W.
    log_p = jnp.maximum(jnp.log(p), -100.0)
    log_1mp = jnp.maximum(jnp.log1p(-p), -100.0)

    cls_acc[0] = cls_acc[0] + jnp.sum(-(y * log_p + (1.0 - y) * log_1mp))
    cls_acc[1] = cls_acc[1] + jnp.sum(p * y)
    cls_acc[2] = cls_acc[2] + jnp.sum(p)
    cls_acc[3] = cls_acc[3] + jnp.sum(y)

    @pl.when(last_tile_of_class)
    def _finish_class():
        smooth = 1e-05
        bce_mean = cls_acc[0] / float(n_elems)
        dsc = (2.0 * cls_acc[1] + smooth) / (cls_acc[2] + cls_acc[3] + smooth)
        tot_acc[0] = tot_acc[0] + bce_mean
        tot_acc[1] = tot_acc[1] + (1.0 - dsc)

    @pl.when((c == nc - 1) & last_tile_of_class)
    def _write_out():
        # 0.5 * sum(bce_c) + sum(1 - dsc_c); the last-class weight `w` is
        # applied by the wrapper.
        out_ref[0, 0] = 0.5 * tot_acc[0] + tot_acc[1]


def weighted_bce_dice_loss(output, y_true, class_weights):
    """output, y_true: [B, C, H, W] (probabilities / one-hot); class_weights: [C]."""
    B, C, H, W = output.shape
    hw = H * W
    rows, lanes, tile_rows = _choose_tiling(hw)
    n_tiles = rows // tile_rows

    # Free, contiguous reshapes — no transpose, no dtype cast (stream native dtype).
    pred = output.reshape(B, C, rows, lanes)
    true = y_true.reshape(B, C, rows, lanes)

    n_elems = B * hw           # elements per class (BCE mean denominator)
    total = B * C * hw

    cost = pl.CostEstimate(
        flops=12 * total,
        transcendentals=2 * total,
        bytes_accessed=int(pred.size * pred.dtype.itemsize
                           + true.size * true.dtype.itemsize),
    )

    block_bytes = tile_rows * lanes * (pred.dtype.itemsize + true.dtype.itemsize)
    vmem_limit = int(min(64 * 1024 * 1024, max(16 * 1024 * 1024, 8 * block_bytes)))

    kernel = functools.partial(_wbce_dice_kernel, n_elems)

    core = pl.pallas_call(
        kernel,
        out_shape=jax.ShapeDtypeStruct((1, 1), jnp.float32),
        grid_spec=pltpu.PrefetchScalarGridSpec(
            num_scalar_prefetch=0,
            grid=(C, B, n_tiles),
            in_specs=[
                pl.BlockSpec((1, 1, tile_rows, lanes), lambda c, b, t: (b, c, t, 0)),
                pl.BlockSpec((1, 1, tile_rows, lanes), lambda c, b, t: (b, c, t, 0)),
            ],
            out_specs=pl.BlockSpec(memory_space=pltpu.SMEM),
            scratch_shapes=[
                pltpu.SMEM((4,), jnp.float32),  # per-class partial sums
                pltpu.SMEM((2,), jnp.float32),  # running BCE / dice totals
            ],
        ),
        compiler_params=pltpu.CompilerParams(
            # All axes are reductions into the shared SMEM accumulators.
            # TODO(synk): v7x dual-TC split would need per-class partial outputs
            # reduced in a JAX epilogue instead of shared SMEM scratch.
            dimension_semantics=("arbitrary", "arbitrary", "arbitrary"),
            vmem_limit_bytes=vmem_limit,
        ),
        cost_estimate=cost,
    )(pred, true)

    # Reference's loop-variable bug: only the LAST class's normalized weight.
    cw = class_weights.astype(jnp.float32)
    w = cw[C - 1] / jnp.sum(cw)
    return w * core[0, 0]


def _reference_loss(output, y_true, class_weights):
    """Pure-JAX port of the PyTorch forward (for correctness check)."""
    smooth = 1e-05
    C = output.shape[1]
    bce = 0.0
    dice = 0.0
    w = 0.0
    for c in range(C):
        w = class_weights[c] / class_weights.sum()
        p = output[:, c].reshape(-1)
        y = y_true[:, c].reshape(-1)
        log_p = jnp.maximum(jnp.log(p), -100.0)
        log_1mp = jnp.maximum(jnp.log1p(-p), -100.0)
        bce = bce + jnp.mean(-(y * log_p + (1.0 - y) * log_1mp))
        inter = jnp.sum(p * y)
        dsc = (2.0 * inter + smooth) / (jnp.sum(p) + jnp.sum(y) + smooth)
        dice = dice + (1.0 - dsc)
    return w * (0.5 * bce + dice)


if __name__ == "__main__":
    key = jax.random.PRNGKey(0)
    k1, k2, k3 = jax.random.split(key, 3)

    B, C, H, W = 2, 4, 16, 16
    # "output" are probabilities in (0,1); "y_true" is one-hot-style 0/1.
    output = jax.nn.sigmoid(jax.random.normal(k1, (B, C, H, W), jnp.float32))
    y_true = (jax.random.uniform(k2, (B, C, H, W)) > 0.5).astype(jnp.float32)
    class_weights = jax.random.uniform(k3, (C,), jnp.float32, 0.5, 2.0)

    # f32 inputs.
    loss = weighted_bce_dice_loss(output, y_true, class_weights)
    loss = jax.block_until_ready(loss)
    ref = _reference_loss(output, y_true, class_weights)
    assert jnp.allclose(loss, ref, rtol=1e-5, atol=1e-5), (loss, ref)

    # Narrow-dtype streaming path (bf16 predictions, f32 math inside kernel).
    output_bf16 = output.astype(jnp.bfloat16)
    loss_bf16 = jax.block_until_ready(
        weighted_bce_dice_loss(output_bf16, y_true, class_weights))
    ref_bf16 = _reference_loss(output_bf16.astype(jnp.float32), y_true, class_weights)
    assert jnp.allclose(loss_bf16, ref_bf16, rtol=1e-5, atol=1e-5), (loss_bf16, ref_bf16)

    print("KERNEL_OK")
</pallas_src>

<mosaic_0001>
module attributes {stable_mosaic.version = 11 : i64} {
  func.func @_wbce_dice_kernel(%arg0: i32, %arg1: i32, %arg2: i32, %arg3: memref<1x1x2x128xf32, #tpu.memory_space<vmem>>, %arg4: memref<1x1x2x128xf32, #tpu.memory_space<vmem>>, %arg5: memref<1x1xf32, #tpu.memory_space<smem>>, %arg6: memref<4xf32, #tpu.memory_space<smem>>, %arg7: memref<2xf32, #tpu.memory_space<smem>>) attributes {dimension_semantics = [#tpu.dimension_semantics<arbitrary>, #tpu.dimension_semantics<arbitrary>, #tpu.dimension_semantics<arbitrary>], iteration_bounds = array<i64: 4, 2, 1>, scalar_prefetch = 0 : i64, scratch_operands = 2 : i64, tpu.core_type = #tpu.core_type<tc>, window_params = [{transform_indices = @transform_0, window_bounds = array<i64: 1, 1, 2, 128>}, {transform_indices = @transform_1, window_bounds = array<i64: 1, 1, 2, 128>}, {transform_indices = @transform_2, window_bounds = array<i64: 1, 1>}]} {
    %c0_i32 = arith.constant 0 : i32
    %0 = arith.cmpi eq, %arg1, %c0_i32 : i32
    %c0_i32_0 = arith.constant 0 : i32
    %1 = arith.cmpi eq, %arg2, %c0_i32_0 : i32
    %2 = arith.andi %0, %1 : i1
    %c1_i32 = arith.constant 1 : i32
    %3 = arith.cmpi eq, %arg1, %c1_i32 : i32
    %c0_i32_1 = arith.constant 0 : i32
    %4 = arith.cmpi eq, %arg2, %c0_i32_1 : i32
    %5 = arith.andi %3, %4 : i1
    %c0_i32_2 = arith.constant 0 : i32
    %6 = arith.cmpi eq, %arg0, %c0_i32_2 : i32
    %7 = arith.andi %6, %2 : i1
    %8 = arith.extui %7 : i1 to i32
    %c0_i32_3 = arith.constant 0 : i32
    %9 = arith.cmpi ne, %8, %c0_i32_3 : i32
    scf.if %9 {
      %cst_27 = arith.constant 0.000000e+00 : f32
      %c0_28 = arith.constant 0 : index
      %66 = memref.load %arg7[%c0_28] : memref<2xf32, #tpu.memory_space<smem>>
      memref.store %cst_27, %arg7[%c0_28] : memref<2xf32, #tpu.memory_space<smem>>
      %cst_29 = arith.constant 0.000000e+00 : f32
      %c1_30 = arith.constant 1 : index
      %67 = memref.load %arg7[%c1_30] : memref<2xf32, #tpu.memory_space<smem>>
      memref.store %cst_29, %arg7[%c1_30] : memref<2xf32, #tpu.memory_space<smem>>
    } else {
    }
    %10 = arith.extui %2 : i1 to i32
    %c0_i32_4 = arith.constant 0 : i32
    %11 = arith.cmpi ne, %10, %c0_i32_4 : i32
    scf.if %11 {
      %cst_27 = arith.constant 0.000000e+00 : f32
      %c0_28 = arith.constant 0 : index
      %66 = memref.load %arg6[%c0_28] : memref<4xf32, #tpu.memory_space<smem>>
      memref.store %cst_27, %arg6[%c0_28] : memref<4xf32, #tpu.memory_space<smem>>
      %cst_29 = arith.constant 0.000000e+00 : f32
      %c1_30 = arith.constant 1 : index
      %67 = memref.load %arg6[%c1_30] : memref<4xf32, #tpu.memory_space<smem>>
      memref.store %cst_29, %arg6[%c1_30] : memref<4xf32, #tpu.memory_space<smem>>
      %cst_31 = arith.constant 0.000000e+00 : f32
      %c2_32 = arith.constant 2 : index
      %68 = memref.load %arg6[%c2_32] : memref<4xf32, #tpu.memory_space<smem>>
      memref.store %cst_31, %arg6[%c2_32] : memref<4xf32, #tpu.memory_space<smem>>
      %cst_33 = arith.constant 0.000000e+00 : f32
      %c3_34 = arith.constant 3 : index
      %69 = memref.load %arg6[%c3_34] : memref<4xf32, #tpu.memory_space<smem>>
      memref.store %cst_33, %arg6[%c3_34] : memref<4xf32, #tpu.memory_space<smem>>
    } else {
    }
    %c0 = arith.constant 0 : index
    %c0_5 = arith.constant 0 : index
    %c0_6 = arith.constant 0 : index
    %c0_7 = arith.constant 0 : index
    %12 = vector.load %arg3[%c0, %c0_5, %c0_6, %c0_7] : memref<1x1x2x128xf32, #tpu.memory_space<vmem>>, vector<1x1x2x128xf32>
    %13 = vector.shape_cast %12 : vector<1x1x2x128xf32> to vector<2x128xf32>
    %c0_8 = arith.constant 0 : index
    %c0_9 = arith.constant 0 : index
    %c0_10 = arith.constant 0 : index
    %c0_11 = arith.constant 0 : index
    %14 = vector.load %arg4[%c0_8, %c0_9, %c0_10, %c0_11] : memref<1x1x2x128xf32, #tpu.memory_space<vmem>>, vector<1x1x2x128xf32>
    %15 = vector.shape_cast %14 : vector<1x1x2x128xf32> to vector<2x128xf32>
    %16 = math.log %13 : vector<2x128xf32>
    %cst = arith.constant -1.000000e+02 : f32
    %17 = vector.broadcast %cst : f32 to vector<2x128xf32>
    %18 = arith.maximumf %16, %17 : vector<2x128xf32>
    %cst_12 = arith.constant 0.000000e+00 : f32
    %19 = vector.broadcast %cst_12 : f32 to vector<2x128xf32>
    %20 = arith.subf %19, %13 : vector<2x128xf32>
    %21 = math.log1p %20 : vector<2x128xf32>
    %cst_13 = arith.constant -1.000000e+02 : f32
    %22 = vector.broadcast %cst_13 : f32 to vector<2x128xf32>
    %23 = arith.maximumf %21, %22 : vector<2x128xf32>
    %c0_14 = arith.constant 0 : index
    %24 = memref.load %arg6[%c0_14] : memref<4xf32, #tpu.memory_space<smem>>
    %25 = arith.mulf %15, %18 : vector<2x128xf32>
    %cst_15 = arith.constant 1.000000e+00 : f32
    %26 = vector.broadcast %cst_15 : f32 to vector<2x128xf32>
    %27 = arith.subf %26, %15 : vector<2x128xf32>
    %28 = arith.mulf %27, %23 : vector<2x128xf32>
    %29 = arith.addf %25, %28 : vector<2x128xf32>
    %cst_16 = arith.constant 0.000000e+00 : f32
    %30 = vector.broadcast %cst_16 : f32 to vector<2x128xf32>
    %31 = arith.subf %30, %29 : vector<2x128xf32>
    %32 = vector.shape_cast %31 : vector<2x128xf32> to vector<1x2x128xf32>
    %cst_17 = arith.constant dense<0.000000e+00> : vector<1xf32>
    %33 = vector.multi_reduction <add>, %32, %cst_17 [1, 2] : vector<1x2x128xf32> to vector<1xf32>
    %34 = vector.shape_cast %33 : vector<1xf32> to vector<1x1x1xf32>
    %35 = vector.extract %34[0, 0, 0] : f32 from vector<1x1x1xf32>
    %36 = arith.addf %24, %35 : f32
    %c0_18 = arith.constant 0 : index
    %37 = memref.load %arg6[%c0_18] : memref<4xf32, #tpu.memory_space<smem>>
    memref.store %36, %arg6[%c0_18] : memref<4xf32, #tpu.memory_space<smem>>
    %c1 = arith.constant 1 : index
    %38 = memref.load %arg6[%c1] : memref<4xf32, #tpu.memory_space<smem>>
    %39 = arith.mulf %13, %15 : vector<2x128xf32>
    %40 = vector.shape_cast %39 : vector<2x128xf32> to vector<1x2x128xf32>
    %cst_19 = arith.constant dense<0.000000e+00> : vector<1xf32>
    %41 = vector.multi_reduction <add>, %40, %cst_19 [1, 2] : vector<1x2x128xf32> to vector<1xf32>
    %42 = vector.shape_cast %41 : vector<1xf32> to vector<1x1x1xf32>
    %43 = vector.extract %42[0, 0, 0] : f32 from vector<1x1x1xf32>
    %44 = arith.addf %38, %43 : f32
    %c1_20 = arith.constant 1 : index
    %45 = memref.load %arg6[%c1_20] : memref<4xf32, #tpu.memory_space<smem>>
    memref.store %44, %arg6[%c1_20] : memref<4xf32, #tpu.memory_space<smem>>
    %c2 = arith.constant 2 : index
    %46 = memref.load %arg6[%c2] : memref<4xf32, #tpu.memory_space<smem>>
    %47 = vector.shape_cast %13 : vector<2x128xf32> to vector<1x2x128xf32>
    %cst_21 = arith.constant dense<0.000000e+00> : vector<1xf32>
    %48 = vector.multi_reduction <add>, %47, %cst_21 [1, 2] : vector<1x2x128xf32> to vector<1xf32>
    %49 = vector.shape_cast %48 : vector<1xf32> to vector<1x1x1xf32>
    %50 = vector.extract %49[0, 0, 0] : f32 from vector<1x1x1xf32>
    %51 = arith.addf %46, %50 : f32
    %c2_22 = arith.constant 2 : index
    %52 = memref.load %arg6[%c2_22] : memref<4xf32, #tpu.memory_space<smem>>
    memref.store %51, %arg6[%c2_22] : memref<4xf32, #tpu.memory_space<smem>>
    %c3 = arith.constant 3 : index
    %53 = memref.load %arg6[%c3] : memref<4xf32, #tpu.memory_space<smem>>
    %54 = vector.shape_cast %15 : vector<2x128xf32> to vector<1x2x128xf32>
    %cst_23 = arith.constant dense<0.000000e+00> : vector<1xf32>
    %55 = vector.multi_reduction <add>, %54, %cst_23 [1, 2] : vector<1x2x128xf32> to vector<1xf32>
    %56 = vector.shape_cast %55 : vector<1xf32> to vector<1x1x1xf32>
    %57 = vector.extract %56[0, 0, 0] : f32 from vector<1x1x1xf32>
    %58 = arith.addf %53, %57 : f32
    %c3_24 = arith.constant 3 : index
    %59 = memref.load %arg6[%c3_24] : memref<4xf32, #tpu.memory_space<smem>>
    memref.store %58, %arg6[%c3_24] : memref<4xf32, #tpu.memory_space<smem>>
    %60 = arith.extui %5 : i1 to i32
    %c0_i32_25 = arith.constant 0 : i32
    %61 = arith.cmpi ne, %60, %c0_i32_25 : i32
    scf.if %61 {
      %c0_27 = arith.constant 0 : index
      %66 = memref.load %arg6[%c0_27] : memref<4xf32, #tpu.memory_space<smem>>
      %cst_28 = arith.constant 5.120000e+02 : f32
      %67 = arith.divf %66, %cst_28 : f32
      %c1_29 = arith.constant 1 : index
      %68 = memref.load %arg6[%c1_29] : memref<4xf32, #tpu.memory_space<smem>>
      %cst_30 = arith.constant 2.000000e+00 : f32
      %69 = arith.mulf %cst_30, %68 : f32
      %cst_31 = arith.constant 9.99999974E-6 : f32
      %70 = arith.addf %69, %cst_31 : f32
      %c2_32 = arith.constant 2 : index
      %71 = memref.load %arg6[%c2_32] : memref<4xf32, #tpu.memory_space<smem>>
      %c3_33 = arith.constant 3 : index
      %72 = memref.load %arg6[%c3_33] : memref<4xf32, #tpu.memory_space<smem>>
      %73 = arith.addf %71, %72 : f32
      %cst_34 = arith.constant 9.99999974E-6 : f32
      %74 = arith.addf %73, %cst_34 : f32
      %75 = arith.divf %70, %74 : f32
      %c0_35 = arith.constant 0 : index
      %76 = memref.load %arg7[%c0_35] : memref<2xf32, #tpu.memory_space<smem>>
      %77 = arith.addf %76, %67 : f32
      %c0_36 = arith.constant 0 : index
      %78 = memref.load %arg7[%c0_36] : memref<2xf32, #tpu.memory_space<smem>>
      memref.store %77, %arg7[%c0_36] : memref<2xf32, #tpu.memory_space<smem>>
      %c1_37 = arith.constant 1 : index
      %79 = memref.load %arg7[%c1_37] : memref<2xf32, #tpu.memory_space<smem>>
      %cst_38 = arith.constant 1.000000e+00 : f32
      %80 = arith.subf %cst_38, %75 : f32
      %81 = arith.addf %79, %80 : f32
      %c1_39 = arith.constant 1 : index
      %82 = memref.load %arg7[%c1_39] : memref<2xf32, #tpu.memory_space<smem>>
      memref.store %81, %arg7[%c1_39] : memref<2xf32, #tpu.memory_space<smem>>
    } else {
    }
    %c3_i32 = arith.constant 3 : i32
    %62 = arith.cmpi eq, %arg0, %c3_i32 : i32
    %63 = arith.andi %62, %5 : i1
    %64 = arith.extui %63 : i1 to i32
    %c0_i32_26 = arith.constant 0 : i32
    %65 = arith.cmpi ne, %64, %c0_i32_26 : i32
    scf.if %65 {
      %c0_27 = arith.constant 0 : index
      %66 = memref.load %arg7[%c0_27] : memref<2xf32, #tpu.memory_space<smem>>
      %cst_28 = arith.constant 5.000000e-01 : f32
      %67 = arith.mulf %cst_28, %66 : f32
      %c1_29 = arith.constant 1 : index
      %68 = memref.load %arg7[%c1_29] : memref<2xf32, #tpu.memory_space<smem>>
      %69 = arith.addf %67, %68 : f32
      %c0_30 = arith.constant 0 : index
      %c0_31 = arith.constant 0 : index
      %70 = memref.load %arg5[%c0_30, %c0_31] : memref<1x1xf32, #tpu.memory_space<smem>>
      memref.store %69, %arg5[%c0_30, %c0_31] : memref<1x1xf32, #tpu.memory_space<smem>>
    } else {
    }
    return
  }
  func.func @transform_0(%arg0: i32, %arg1: i32, %arg2: i32) -> (i32, i32, i32, i32) {
    %c0_i32 = arith.constant 0 : i32
    %c0_i32_0 = arith.constant 0 : i32
    return %arg1, %arg0, %arg2, %c0_i32 : i32, i32, i32, i32
  }
  func.func @transform_1(%arg0: i32, %arg1: i32, %arg2: i32) -> (i32, i32, i32, i32) {
    %c0_i32 = arith.constant 0 : i32
    %c0_i32_0 = arith.constant 0 : i32
    return %arg1, %arg0, %arg2, %c0_i32 : i32, i32, i32, i32
  }
  func.func @transform_2(%arg0: i32, %arg1: i32, %arg2: i32) -> (i32, i32) {
    %c0_i32 = arith.constant 0 : i32
    %c0_i32_0 = arith.constant 0 : i32
    %c0_i32_1 = arith.constant 0 : i32
    return %c0_i32, %c0_i32_0 : i32, i32
  }
}

</mosaic_0001>

<bundles_post_ra>
// kernel: tpu_custom_call.1
= control target key start
LH: loop header
LB: loop body
LE: loop exit
PB: predicated region body
PF: predicated region fallthrough
CT: control target
= control target key end

     0   :  { %7 = vsyncpa [#allocation5], 0  ;;  %s986_s0 = inlined_call_operand.hbm [shape: f32[2,4,2,128], index: 0, kind: input, shape index: {}]   ;;  %s987_s1 = inlined_call_operand.hbm [shape: f32[2,4,2,128], index: 1, kind: input, shape index: {}]   ;;  %s988_s2 = inlined_call_operand.hbm [shape: f32[1,1], index: 2, kind: output, shape index: {}]  }
   0x1   :  { %9 = vsyncpa [#allocation5 + $0x1], 0 }
   0x2   :  { %10 = vsyncpa [#allocation8], 0 }
   0x3   :  { %12 = vsyncpa [#allocation8 + $0x1], 0 }
   0x4   :  { %13 = vsyncpa [#allocation6], 0  ;;  %s763_s9 = smov 0   ;;  %s765_s10 = smov 0  }
   0x5   :  { %s767_s11 = smov 0   ;;  %s769_s12 = smov 0  }
   0x6   :  { %s771_s13 = smov 0   ;;  %s773_s14 = smov 0  }
   0x7   :  { %s775_s15 = smov 0   ;;  %s777_s16 = smov 0  }
   0x8 LB: > { %s459_s17 = sadd.s32 4294967295, %s742_s16   ;;  %s34_s18 = sadd.s32 1, %s734_s14  ;;  %s742_s16 = sphi %s777_s16, %s19_s16   ;;  %s738_s15 = sphi %s775_s15, %s1004_s15   ;;  %s734_s14 = sphi %s773_s14, %s1003_s14   ;;  %s730_s13 = sphi %s771_s13, %s1002_s13   ;;  %s726_s12 = sphi %s769_s12, %s1001_s12   ;;  %s722_s11 = sphi %s767_s11, %s1000_s11   ;;  %s718_s10 = sphi %s765_s10, %s999_s10   ;;  %s714_s9 = sphi %s763_s9, %s998_s9  }
   0x9   : > { %p36_p0 = scmp.ge.s32.totalorder %s34_s18, 2  ;;  %s38_s19 = sadd.s32 1, %s738_s15 }
   0xa   : > { %s49_s20 = sadd.s32 1, %s722_s11  ;;  %p56_p1 = scmp.ne.s32.totalorder %s722_s11, %s718_s10 }
   0xb   : > { %s1006_s18 = smov (%p36_p0, %s34_s18), 0  ;;  %s1008_s19 = smov (!%p36_p0, %s38_s19), %s738_s15 }
   0xc   : > { %s42_s21 = ssub.s32 %s734_s14, %s1006_s18  ;;  %p57_p2 = scmp.eq.s32.totalorder %s742_s16, 0 }
   0xd   : > { %p40_p3 = scmp.ge.s32.totalorder %s1008_s19, 4  ;;  %p62_p4 = scmp.ne.s32.totalorder %s718_s10, %s714_s9 }
   0xe   : > { %p814_p5 = por %p57_p2, %p56_p1  ;;  %p63_p6 = scmp.eq.s32.totalorder %s459_s17, 0 }
   0xf   : > { %s1010_s19 = smov (%p40_p3, %s1008_s19), 0  ;;  %p521_p8 = scmp.lt.s32.totalorder %s742_s16, 8 }
  0x10   : > { %p822_p7 = por %p63_p6, %p62_p4  ;;  %s43_s24 = ssub.s32 %s738_s15, %s1010_s19 }
  0x11   : > { %s44_s25 = sor.u32 %s43_s24, %s42_s21  ;;  %s830_s26 = sand.u32 1, %s722_s11  }
  0x12   : > { %s991_s23 = scalar_select %p822_p7, 1, 0 }
  0x13   : > { %p47_p9 = scmp.eq.s32.totalorder %s44_s25, 0  ;;  %s462_s27 = sshll.u32 %s830_s26, 1 }
  0x14   : > { %s463_s28 = sshll.u32 %s734_s14, 2  ;;  %s141_s4 = scalar_lea.vmem [#allocation4], %s462_s27 }
  0x15   : > { %s835_s29 = scalar_select %p47_p9, %s722_s11, %s49_s20  }
  0x16   : > { %s838_s30 = sadd.s32 %s738_s15, %s463_s28  ;;  %s151_s5 = sshll.u32 %s141_s4, 4  ;;  %s850_s5 = int_to_ptr.vmem [resolvable:$true] %s151_s5 }
  0x17   : > { %s464_s3 = sshll.u32 %s838_s30, 5  ;;  %p856_p10 = pnand %p521_p8, %p814_p5 }
  0x18   : > { %s848_s8 = scalar_lea.hbm %s986_s0, %s464_s3  ;;  %s138_s20 = scalar_lea.sflag [#allocation5], %s830_s26 }
  0x19   : > { %s596_s21 = scalar_lea.hbm %s848_s8, 32  ;;  %p598_p0 = pneg %p856_p10 }
  0x1a   : > { %p597_p13 = scmp.ne.s32.totalorder %s848_s8, %s596_s21  ;;  %s601_s25 = scalar_lea.hbm %s986_s0, 256 }
  0x1b   : > { %p602_p3 = scmp.lt.u32.totalorder %s848_s8, %s986_s0  ;;  %p603_p4 = scmp.lt.u32.totalorder %s601_s25, %s596_s21 }
  0x1c   : > { %p599_p1 = pnand %p598_p0, %p597_p13  ;;  %p605_p6 = scmp.lt.u32.totalorder %s596_s21, %s848_s8 }
  0x1d   : > { %p604_p5 = por %p603_p4, %p602_p3 }
  0x1e   : > { %p600_p2 = pneg %p599_p1 }
  0x1f   : > { %p606_p8 = por %p605_p6, %p604_p5 }
  0x21   : > { %p607_p9 = pnand %p606_p8, %p600_p2 }
  0x23   : > { %610 = shalt.err (!%p607_p9)
}
  0x24   : > { %s611_s6 = scalar_lea.vmem %s850_s5, 32  ;;  %s744_s7 = smov [#allocation4]  }
  0x25   : > { %p612_p13 = scmp.ne.s32.totalorder %s850_s5, %s611_s6  ;;  %s616_s24 = sshll.u32 %s744_s7, 4  ;;  %s617_s24 = int_to_ptr.vmem [resolvable:$false] %s616_s24 }
  0x26   : > { %s618_s22 = scalar_lea.vmem %s617_s24, 64  ;;  %p619_p12 = scmp.lt.s32.totalorder %s850_s5, %s617_s24 }
  0x27   : > { %p614_p1 = pnand %p612_p13, %p598_p0  ;;  %p620_p3 = scmp.lt.s32.totalorder %s618_s22, %s611_s6 }
  0x29   : > { %p615_p11 = pneg %p614_p1  ;;  %p621_p4 = por %p620_p3, %p619_p12 }
  0x2b   : > { %p622_p5 = pnand %p621_p4, %p615_p11 }
  0x2d   : > { %625 = shalt.err (!%p622_p5)
}
  0x2e   : > { %517 = dma.hbm_to_vmem [thread:$0]  (!%p856_p10), %s848_s8, 32, %s850_s5, %s138_s20  }
  0x2f   : > { %p993_p2 = scmp.lt.s32.totalorder %s742_s16, 9  ;;  %p994_p6 = scmp.ge.s32.totalorder %s742_s16, 1 }
  0x30   : > { %s901_s4 = scalar_lea.hbm %s987_s1, %s464_s3  ;;  %s162_s6 = scalar_lea.vmem [#allocation7], %s462_s27 }
  0x31   : > { %p892_p8 = pnand %p994_p6, %p993_p2  ;;  %s172_s7 = sshll.u32 %s162_s6, 4  ;;  %s173_s7 = int_to_ptr.vmem [resolvable:$true] %s172_s7 }
  0x32   : > { %s159_s5 = scalar_lea.sflag [#allocation8], %s830_s26  ;;  %s626_s8 = scalar_lea.hbm %s901_s4, 32 }
  0x33   : > { %s995_s21 = scalar_select %p892_p8, 1, 0 }
  0x34   : > { %p627_p11 = scmp.ne.s32.totalorder %s901_s4, %s626_s8  ;;  %s631_s3 = scalar_lea.hbm %s987_s1, 256 }
  0x35   : > { %p632_p13 = scmp.lt.u32.totalorder %s901_s4, %s987_s1  ;;  %p633_p1 = scmp.lt.u32.totalorder %s631_s3, %s626_s8 }
  0x36   : > { %p629_p12 = pnand %p627_p11, %p598_p0  ;;  %p635_p4 = scmp.lt.u32.totalorder %s626_s8, %s901_s4 }
  0x37   : > { %p634_p3 = por %p633_p1, %p632_p13 }
  0x38   : > { %p630_p9 = pneg %p629_p12 }
  0x39   : > { %p636_p5 = por %p635_p4, %p634_p3 }
  0x3b   : > { %p637_p2 = pnand %p636_p5, %p630_p9 }
  0x3d   : > { %640 = shalt.err (!%p637_p2)
}
  0x3e   : > { %s641_s26 = scalar_lea.vmem %s173_s7, 32  ;;  %s745_s27 = smov [#allocation7]  }
  0x3f   : > { %p642_p6 = scmp.ne.s32.totalorder %s173_s7, %s641_s26  ;;  %s646_s25 = sshll.u32 %s745_s27, 4  ;;  %s647_s25 = int_to_ptr.vmem [resolvable:$false] %s646_s25 }
  0x40   : > { %s648_s28 = scalar_lea.vmem %s647_s25, 64  ;;  %p649_p7 = scmp.lt.s32.totalorder %s173_s7, %s647_s25 }
  0x41   : > { %p644_p11 = pnand %p642_p6, %p598_p0  ;;  %p650_p8 = scmp.lt.s32.totalorder %s648_s28, %s641_s26 }
  0x43   : > { %p645_p12 = pneg %p644_p11  ;;  %p651_p1 = por %p650_p8, %p649_p7 }
  0x45   : > { %p652_p13 = pnand %p651_p1, %p645_p12 }
  0x47   : > { %655 = shalt.err (!%p652_p13)
}
  0x48   : > { %520 = dma.hbm_to_vmem [thread:$0]  (!%p856_p10), %s901_s4, 32, %s173_s7, %s159_s5  }
  0x49   : > { %p996_p9 = scmp.ne.s32.totalorder %s995_s21, 0 }
  0x4a   : > { %s183_s6 = sand.u32 (!%p996_p9), 1, %s718_s10   ;;  %p997_p0 = scmp.ne.s32.totalorder (!%p996_p9), %s991_s23, 0 }
  0x4b   : > { %181 = sbr.rel (%p996_p9) target bundleno = 424 (0x1a8), region = 28  ;;  %s469_s8 = sshll.u32 (!%p996_p9), %s183_s6, 1 }
  0x4c   : > { %s184_s30 = scalar_lea.sflag (!%p996_p9), [#allocation5], %s183_s6  ;;  %s187_s20 = scalar_lea.vmem (!%p996_p9), [#allocation4], %s469_s8 }
  0x52   : > { %701 = dma.done.wait (%p997_p0), %s184_s30, 32  }
  0x53   : > { %703 = vsyncadd (%p997_p0), %s184_s30, 4294967264  ;;  %s193_s3 = scalar_lea.sflag [#allocation8], %s183_s6  ;;  %s196_s24 = scalar_lea.vmem [#allocation7], %s469_s8 }
  0x54   : > { %705 = dma.done.wait (%p997_p0), %s193_s3, 32  }
  0x55   : > { %707 = vsyncadd (%p997_p0), %s193_s3, 4294967264  ;;  %vm265_vm0 = vcmask 1041408   ;;  %v243_v0 = vld [vmem:[%s187_s20] sm:$0x3]  ;;  %v244_v3 = vld [vmem:[%s196_s24] sm:$0x3] }
  0x56   : > { %v295_v1 = vsel %vm265_vm0, %v243_v0, 0.0  ;;  %590 = vlog2.f32 %v243_v0  ;;  %v248_v2 = vsub.f32 0.0, %v243_v0  ;;  %v309_v4 = vsel %vm265_vm0, %v244_v3, 0.0  ;;  %p221_p7 = scmp.eq.s32.totalorder %s726_s12, 1  ;;  %p217_p10 = scmp.eq.s32.totalorder %s726_s12, 0 }
  0x57   : > { %296 = vadd.xlane.f32.xlu1 %v295_v1  ;;  %v261_v15 = vsub.f32 1.0, %v244_v3  ;;  %v280_v22 = vmul.f32 %v244_v3, %v243_v0  ;;  %p224_p8 = scmp.eq.s32.totalorder %s730_s13, 0  ;;  %s746_s23 = smov 0.0  }
  0x58   : > { %v249_v5 = vadd.f32 1.0, %v248_v2  ;;  %v252_v6 = vmul.f32 -0.5, %v248_v2  ;;  %v255_v9 = vand.u32 2147483647, %v248_v2  ;;  %504 = sst [smem:[#allocation2]] (%p217_p10), %s746_s23 }
  0x59   : > { %v281_v24 = vsel %vm265_vm0, %v280_v22, 0.0  ;;  %p225_p3 = pnand %p224_p8, %p217_p10  ;;  %505 = sst [smem:[#allocation2 + $0x1]] (%p217_p10), %s746_s23 }
  0x5a   : > { %592 = vlog2.f32 %v249_v5  ;;  %v253_v7 = vadd.f32 1.0, %v252_v6  ;;  %vm256_vm1 = vcmp.lt.f32.partialorder %v255_v9, 0.0004427343  ;;  %506 = sst [smem:[#allocation2 + $0x2]] (%p217_p10), %s746_s23  ;;  %s259_s9 = sld [smem:[#allocation2]] }
  0x5b   : > { %310 = vadd.xlane.f32.xlu1 %v309_v4  ;;  %502 = sst [smem:[#allocation3]] (!%p225_p3), %s746_s23  ;;  %s473_s21 = sld [smem:[#allocation2 + $0x1]] }
  0x5c   : > { %v254_v11 = vmul.f32 %v253_v7, %v248_v2  ;;  %503 = sst [smem:[#allocation3 + $0x1]] (!%p225_p3), %s746_s23  ;;  %s474_s4 = sld [smem:[#allocation2 + $0x2]] }
  0x5d   : > { %507 = sst [smem:[#allocation2 + $0x3]] (%p217_p10), %s746_s23  ;;  %s339_s24 = sld [smem:[#allocation3]] (%p221_p7) }
  0x5e   : > { %s475_s22 = sld [smem:[#allocation2 + $0x3]] }
  0x60   : > { %v591_v8 = vpop.eup %590 }
  0x61   : > { %v246_v10 = vmul.f32 0.6931472, %v591_v8 }
  0x63   : > { %v247_v13 = vmax.f32 %v246_v10, -100.0 }
  0x64   : > { %v593_v12 = vpop.eup %592 }
  0x65   : > { %v251_v14 = vmul.f32 0.6931472, %v593_v12  ;;  %v260_v18 = vmul.f32 %v247_v13, %v244_v3 }
  0x67   : > { %v257_v16 = vsel %vm256_vm1, %v254_v11, %v251_v14 }
  0x68   : > { %v258_v17 = vmax.f32 %v257_v16, -100.0 }
  0x6a   : > { %v262_v19 = vmul.f32 %v261_v15, %v258_v17 }
  0x6c   : > { %v263_v20 = vadd.f32 %v262_v19, %v260_v18 }
  0x6e   : > { %v264_v21 = vsub.f32 0.0, %v263_v20 }
  0x70   : > { %v266_v23 = vsel %vm265_vm0, %v264_v21, 0.0 }
  0x71   : > { %267 = vadd.xlane.f32.xlu0 %v266_v23 }
  0x75   : > { %282 = vadd.xlane.f32.xlu0 %v281_v24 }
  0xe4   : > { %v297_v25 = vpop.xlane.xlu1 %296 }
  0xe5   : > { %v298_v27 = vrot.slane %v297_v25, 4 }
  0xe7   : > { %v299_v29 = vadd.f32 %v298_v27, %v297_v25 }
  0xe8   : > { %v311_v26 = vpop.xlane.xlu1 %310 }
  0xe9   : > { %v312_v28 = vrot.slane %v311_v26, 4  ;;  %v300_v34 = vrot.slane %v299_v29, 2 }
  0xeb   : > { %v313_v31 = vadd.f32 %v312_v28, %v311_v26  ;;  %v301_v41 = vadd.f32 %v300_v34, %v299_v29 }
  0xed   : > { %v314_v36 = vrot.slane %v313_v31, 2  ;;  %v302_v47 = vrot.slane %v301_v41, 1 }
  0xef   : > { %v315_v42 = vadd.f32 %v314_v36, %v313_v31  ;;  %v303_v51 = vadd.f32 %v302_v47, %v301_v41 }
  0xf1   : > { %v316_v49 = vrot.slane %v315_v42, 1 }
  0xf3   : > { %v317_v52 = vadd.f32 %v316_v49, %v315_v42 }
  0xfe   : > { %v268_v30 = vpop.xlane.xlu0 %267 }
  0xff   : > { %v269_v32 = vrot.slane %v268_v30, 4 }
 0x101   : > { %v270_v33 = vadd.f32 %v269_v32, %v268_v30 }
 0x102   : > { %v283_v35 = vpop.xlane.xlu0 %282 }
 0x103   : > { %v271_v37 = vrot.slane %v270_v33, 2  ;;  %v284_v38 = vrot.slane %v283_v35, 4 }
 0x105   : > { %v285_v39 = vadd.f32 %v284_v38, %v283_v35  ;;  %v272_v40 = vadd.f32 %v271_v37, %v270_v33 }
 0x107   : > { %v286_v43 = vrot.slane %v285_v39, 2  ;;  %v273_v44 = vrot.slane %v272_v40, 1 }
 0x109   : > { %v287_v45 = vadd.f32 %v286_v43, %v285_v39  ;;  %v274_v46 = vadd.f32 %v273_v44, %v272_v40 }
 0x10b   : > { %487 = vpush %v274_v46  ;;  %v288_v48 = vrot.slane %v287_v45, 1 }
 0x10d   : > { %v289_v50 = vadd.f32 %v288_v48, %v287_v45 }
 0x10f   : > { %489 = vpush %v289_v50 }
 0x110   : > { %491 = vpush %v303_v51 }
 0x111   : > { %493 = vpush %v317_v52 }
 0x13c   : > { %s488_s7 = spop %487 }
 0x13d   : > { %s276_s5 = sadd.f32 %s488_s7, %s259_s9 }
 0x13f   : > { %278 = sst [smem:[#allocation2]] %s276_s5 }
 0x140   : > { %s490_s26 = spop %489  ;;  %s324_s30 = sld [smem:[#allocation2]] (%p221_p7) }
 0x141   : > { %s291_s27 = sadd.f32 %s490_s26, %s473_s21  ;;  %s492_s25 = spop %491 }
 0x142   : > { %s305_s28 = sadd.f32 %s492_s25, %s474_s4  ;;  %s494_s6 = spop %493 }
 0x143   : > { %293 = sst [smem:[#allocation2 + $0x1]] %s291_s27  ;;  %323 = sbr.rel (!%p221_p7) target bundleno = 407 (0x197), region = 48 }
 0x144   : > { %307 = sst [smem:[#allocation2 + $0x2]] %s305_s28  ;;  %s476_s21 = sld [smem:[#allocation2 + $0x1]] (%p221_p7) }
 0x145   : > { %s319_s8 = sadd.f32 %s494_s6, %s475_s22  ;;  %s477_s20 = sld [smem:[#allocation2 + $0x2]] (%p221_p7) }
 0x146   : > { %s327_s23 = smul.f32 (%p221_p7), 0.001953125, %s324_s30  ;;  %s479_s26 = sld [smem:[#allocation3 + $0x1]] (%p221_p7) }
 0x147   : > { %321 = sst [smem:[#allocation2 + $0x3]] %s319_s8 }
 0x148   : > { %s478_s3 = sld [smem:[#allocation2 + $0x3]] (%p221_p7)  ;;  %s340_s7 = sadd.f32 (%p221_p7), %s339_s24, %s327_s23 }
 0x14a   : > { %342 = sst [smem:[#allocation3]] %s340_s7  ;;  %s329_s4 = smul.f32 2.0, %s476_s21 }
 0x14c   : > { %s330_s22 = sadd.f32 1e-05, %s329_s4 }
 0x14e   : > { %s333_s9 = sadd.f32 %s478_s3, %s477_s20 }
 0x150   : > { %s334_s5 = sadd.f32 1e-05, %s333_s9 }
 0x152   : > { %v335_v53 = vstv %s334_s5 }
 0x153   : > { %594 = vrcp.f32 %v335_v53 }
 0x15d   : > { %v595_v54 = vpop.eup %594 }
 0x15e   : > { %495 = vpush %v595_v54 }
 0x18f   : > { %s496_s27 = spop %495 }
 0x190   : > { %s338_s25 = smul.f32 %s496_s27, %s330_s22 }
 0x192   : > { %s344_s28 = ssub.f32 1.0, %s338_s25 }
 0x194   : > { %s345_s6 = sadd.f32 %s479_s26, %s344_s28 }
 0x196   : > { %347 = sst [smem:[#allocation3 + $0x1]] %s345_s6 }
 0x197 PF: > { %p348_p4 = scmp.eq.s32.totalorder %s730_s13, 3  ;;  %s353_s8 = sld [smem:[#allocation3]] }
 0x198   : > { %s480_s30 = sld [smem:[#allocation3 + $0x1]]  ;;  %p522_p2 = scmp.eq.s32.totalorder %s459_s17, 7 }
 0x199   : > { %p349_p5 = pnand %p348_p4, %p221_p7  ;;  %s656_s9 = scalar_lea.hbm %s988_s2, 16 }
 0x19a   : > { %p657_p6 = scmp.ne.s32.totalorder %s988_s2, %s656_s9  ;;  %p662_p1 = scmp.lt.u32.totalorder %s656_s9, %s988_s2 }
 0x19c   : > { %p658_p11 = pnand %p657_p6, %p522_p2 }
 0x19d   : > { %s354_s20 = smul.f32 0.5, %s353_s8 }
 0x19e   : > { %p659_p12 = pneg %p658_p11 }
 0x19f   : > { %s356_s3 = sadd.f32 %s480_s30, %s354_s20 }
 0x1a0   : > { %p664_p13 = pnand %p662_p1, %p659_p12 }
 0x1a1   : > { %509 = sst [smem:[#allocation9]] (!%p349_p5), %s356_s3 }
 0x1a2   : > { %667 = shalt.err (!%p664_p13)
}
 0x1a3   : > { %s747_s12 = smov [#allocation9]  }
 0x1a4   : > { %511 = dma.smem_to_hbm (%p522_p2), %s747_s12, 16, %s988_s2, [#allocation6]  }
 0x1a5   : > { %709 = dma.done.wait (%p522_p2), [#allocation6], 16  }
 0x1a6   : > { %711 = vsyncadd (%p522_p2), [#allocation6], 4294967280 }
 0x1a7   : > { %372 = sfence }
 0x1a8 PF: > { %s19_s16 = sadd.s32 1, %s742_s16   ;;  %s998_s9 = smov %s718_s10 }
 0x1a9   : > { %p16_p9 = scmp.ge.s32.totalorder %s19_s16, 10   ;;  %s999_s10 = smov %s722_s11 }
 0x1aa   : > { %s1000_s11 = smov %s835_s29  ;;  %s1001_s12 = smov %s734_s14 }
 0x1ab   : > { %s1002_s13 = smov %s738_s15  ;;  %s1003_s14 = smov %s1006_s18 }
 0x1ac   : > { %s1004_s15 = smov %s1010_s19  ;;  %18 = sbr.rel (!%p16_p9) target bundleno = 8 (0x8), region = 107 }
 0x1b3   :  { %378 = vsyncpa [#allocation5], 1 }
 0x1b4   :  { %380 = vsyncpa [#allocation5 + $0x1], 1 }
 0x1b5   :  { %381 = vsyncpa [#allocation8], 1 }
 0x1b6   :  { %383 = vsyncpa [#allocation8 + $0x1], 1 }
 0x1b7   :  { %384 = vsyncpa [#allocation6], 1 }
 0x1b8   :  { %386 = vsyncpa [#allocation6 + $0x1], 1 }

</bundles_post_ra>
